<compile_context>
chip_gen: v6e
topology: v6e:2x2x1
jax: 0.10.0
libtpu: 0.0.40
codegen_flags: <defaults>
</compile_context>

<pallas_src>
import functools

import jax
import jax.numpy as jnp
from jax import lax
from jax.experimental import pallas as pl
from jax.experimental.pallas import tpu as pltpu

# ----- module config (config['model']['d_model']=32, n_latents=4) -----------
D_MODEL = 32
N_LATENTS = 4
LATENT = D_MODEL * N_LATENTS          # 128
H1 = LATENT // 2                      # 64
H2 = LATENT // 4                      # 32
DROPOUT_P = 0.1                       # eval mode -> identity
LN_EPS = 1e-5
LEAKY_SLOPE = 0.01                    # F.leaky_relu default


def _device_kind():
    try:
        return jax.devices()[0].device_kind.lower()
    except Exception:
        return ""


_KIND = _device_kind()
_HAS_BF16_VPU = ("v6" in _KIND) or ("v7" in _KIND)   # v5e/v5p: f32-only VPU
_TWO_TENSORCORES = "v7" in _KIND                      # v7x: 2 TCs per chip


def _round_up(n, m):
    return ((n + m - 1) // m) * m


def discriminator_kernel(x_ref,
                         w1_ref, b1_ref,
                         w2_ref, b2_ref,        # LN1 gamma/beta folded in
                         g2_ref, be2_ref,
                         w3_ref, b3_ref,
                         o_ref, *, ew_dtype):
    """One batch tile: (bb, 128) -> (bb, 1). Every op is per-row."""
    wdt = w1_ref.dtype

    # lin1 (+ bias); x cast to weight dtype here (no wrapper pass), f32 accum.
    h1 = jnp.dot(x_ref[...].astype(wdt), w1_ref[...],
                 preferred_element_type=jnp.float32) + b1_ref[...]

    # LayerNorm1: one-pass stats in f32; gamma1/beta1 are folded into w2/b2.
    mu1 = jnp.mean(h1, axis=-1, keepdims=True)
    ms1 = jnp.mean(h1 * h1, axis=-1, keepdims=True)
    inv1 = lax.rsqrt(ms1 - mu1 * mu1 + LN_EPS)
    n1 = (h1.astype(ew_dtype) - mu1.astype(ew_dtype)) * inv1.astype(ew_dtype)

    # lin2 (+ folded bias), f32 accumulation.
    h2 = jnp.dot(n1.astype(wdt), w2_ref[...],
                 preferred_element_type=jnp.float32) + b2_ref[...]

    # LayerNorm2 (stats in f32; normalize/affine in ew_dtype).
    mu2 = jnp.mean(h2, axis=-1, keepdims=True)
    ms2 = jnp.mean(h2 * h2, axis=-1, keepdims=True)
    inv2 = lax.rsqrt(ms2 - mu2 * mu2 + LN_EPS)
    n2 = (h2.astype(ew_dtype) - mu2.astype(ew_dtype)) * inv2.astype(ew_dtype)
    y = n2 * g2_ref[...].astype(ew_dtype) + be2_ref[...].astype(ew_dtype)

    # leaky_relu as a single max (valid because 0 < slope < 1).
    a = jnp.maximum(y, y * LEAKY_SLOPE)

    # lin3 on VPU + XLU: elementwise multiply by w3 row, lane-reduce in f32.
    prod = (a * w3_ref[...].astype(ew_dtype)).astype(jnp.float32)
    out = jnp.sum(prod, axis=-1, keepdims=True)
    o_ref[...] = (out + b3_ref[...]).astype(o_ref.dtype)


@functools.partial(jax.jit, static_argnames=("block_b", "use_bf16", "ew_bf16"))
def discriminator_forward(x, params, *, block_b=2048, use_bf16=True,
                          ew_bf16=None):
    B, L = x.shape
    assert L == LATENT
    assert block_b % 128 == 0

    if ew_bf16 is None:
        ew_bf16 = bool(use_bf16 and _HAS_BF16_VPU)
    ew_dtype = jnp.bfloat16 if ew_bf16 else jnp.float32
    wdt = jnp.bfloat16 if use_bf16 else jnp.float32

    # --- batch tile selection ------------------------------------------------
    if _TWO_TENSORCORES and B >= 256:
        # Force >= 2 grid steps so both TensorCores get work on v7x.
        bb = min(block_b, _round_up(pl.cdiv(B, 2), 128))
    elif B <= block_b:
        bb = _round_up(B, 8)          # single sublane-aligned block
    else:
        bb = block_b
    n_blocks = pl.cdiv(B, bb)         # ragged tail handled by edge masking

    w1, b1, g1, be1, w2, b2, g2, be2, w3, b3 = params

    # Fold LayerNorm1's affine into lin2 (exact, O(H1*H2), once per call):
    #   (n*g1 + be1) @ w2 + b2 == n @ (g1^T * w2) + (be1 @ w2 + b2)
    w2f = g1.reshape(H1, 1) * w2
    b2f = jnp.dot(be1, w2, precision=lax.Precision.HIGHEST) + b2

    w1k = w1.astype(wdt)
    w2k = w2f.astype(wdt)
    w3k = w3.reshape(1, H2)           # row vector; cast to ew_dtype in-kernel

    full = lambda shape: pl.BlockSpec(shape, lambda i: (0, 0))
    in_specs = [
        pl.BlockSpec((bb, LATENT), lambda i: (i, 0)),     # x tile (native f32)
        full((LATENT, H1)), full((1, H1)),                # w1, b1
        full((H1, H2)),     full((1, H2)),                # w2 (folded), b2'
        full((1, H2)),      full((1, H2)),                # gamma2, beta2
        full((1, H2)),      full((1, 1)),                 # w3 row, b3
    ]
    out_spec = pl.BlockSpec((bb, 1), lambda i: (i, 0))

    kernel = functools.partial(discriminator_kernel, ew_dtype=ew_dtype)
    out = pl.pallas_call(
        kernel,
        out_shape=jax.ShapeDtypeStruct((B, 1), jnp.float32),
        grid_spec=pltpu.PrefetchScalarGridSpec(
            num_scalar_prefetch=0,
            grid=(n_blocks,),
            in_specs=in_specs,
            out_specs=out_spec,
        ),
        compiler_params=pltpu.CompilerParams(
            dimension_semantics=("parallel",)),
    )(x, w1k, b1, w2k, b2f, g2, be2, w3k, b3)
    return out


def init_params(key):
    ks = jax.random.split(key, 6)
    s1 = 1.0 / jnp.sqrt(LATENT)
    s2 = 1.0 / jnp.sqrt(H1)
    s3 = 1.0 / jnp.sqrt(H2)
    w1 = jax.random.uniform(ks[0], (LATENT, H1), jnp.float32, -s1, s1)
    b1 = jax.random.uniform(ks[1], (1, H1), jnp.float32, -s1, s1)
    w2 = jax.random.uniform(ks[2], (H1, H2), jnp.float32, -s2, s2)
    b2 = jax.random.uniform(ks[3], (1, H2), jnp.float32, -s2, s2)
    w3 = jax.random.uniform(ks[4], (H2, 1), jnp.float32, -s3, s3)
    b3 = jax.random.uniform(ks[5], (1, 1), jnp.float32, -s3, s3)
    g1, be1 = jnp.ones((1, H1), jnp.float32), jnp.zeros((1, H1), jnp.float32)
    g2, be2 = jnp.ones((1, H2), jnp.float32), jnp.zeros((1, H2), jnp.float32)
    return (w1, b1, g1, be1, w2, b2, g2, be2, w3, b3)


def reference_forward(x, params):
    (w1, b1, g1, be1, w2, b2, g2, be2, w3, b3) = params

    def ln(h, g, b):
        mu = jnp.mean(h, axis=-1, keepdims=True)
        var = jnp.mean(jnp.square(h - mu), axis=-1, keepdims=True)
        return (h - mu) * lax.rsqrt(var + LN_EPS) * g + b

    h = ln(x @ w1 + b1, g1, be1)
    h = ln(h @ w2 + b2, g2, be2)
    h = jnp.where(h > 0, h, LEAKY_SLOPE * h)
    return h @ w3 + b3


if __name__ == "__main__":
    key = jax.random.PRNGKey(0)
    k_x, k_x2, k_p = jax.random.split(key, 3)
    params = init_params(k_p)

    # --- small batch, exact f32 path (single block) --------------------------
    B = 8
    x = jax.random.normal(k_x, (B, LATENT), jnp.float32)
    ref = reference_forward(x, params)
    out_f32 = jax.block_until_ready(
        discriminator_forward(x, params, use_bf16=False, ew_bf16=False))
    assert out_f32.shape == (B, 1)
    assert jnp.allclose(out_f32, ref, atol=1e-3, rtol=1e-3), \
        float(jnp.max(jnp.abs(out_f32 - ref)))

    # --- default fast path (bf16 weights; bf16 elementwise on v6e/v7x) -------
    out_fast = jax.block_until_ready(discriminator_forward(x, params))
    assert out_fast.shape == (B, 1)
    assert jnp.allclose(out_fast, ref, atol=1e-1, rtol=1e-1), \
        float(jnp.max(jnp.abs(out_fast - ref)))

    # --- multi-block grid + ragged tail (edge block masked on write) ---------
    B2 = 200
    x2 = jax.random.normal(k_x2, (B2, LATENT), jnp.float32)
    ref2 = reference_forward(x2, params)
    out2 = jax.block_until_ready(
        discriminator_forward(x2, params, block_b=128))
    assert out2.shape == (B2, 1)
    assert jnp.allclose(out2, ref2, atol=1e-1, rtol=1e-1), \
        float(jnp.max(jnp.abs(out2 - ref2)))

    print("KERNEL_OK")
</pallas_src>

<mosaic_0001>
module attributes {stable_mosaic.version = 11 : i64} {
  func.func @discriminator_kernel(%arg0: i32, %arg1: memref<8x128xf32, #tpu.memory_space<vmem>>, %arg2: memref<128x64xf32, #tpu.memory_space<vmem>>, %arg3: memref<1x64xf32, #tpu.memory_space<vmem>>, %arg4: memref<64x32xf32, #tpu.memory_space<vmem>>, %arg5: memref<1x32xf32, #tpu.memory_space<vmem>>, %arg6: memref<1x32xf32, #tpu.memory_space<vmem>>, %arg7: memref<1x32xf32, #tpu.memory_space<vmem>>, %arg8: memref<1x32xf32, #tpu.memory_space<vmem>>, %arg9: memref<1x1xf32, #tpu.memory_space<vmem>>, %arg10: memref<8x1xf32, #tpu.memory_space<vmem>>) attributes {dimension_semantics = [#tpu.dimension_semantics<parallel>], iteration_bounds = array<i64: 1>, scalar_prefetch = 0 : i64, scratch_operands = 0 : i64, tpu.core_type = #tpu.core_type<tc>, window_params = [{transform_indices = @transform_0, window_bounds = array<i64: 8, 128>}, {pipeline_mode = #tpu.pipeline_mode<synchronous>, transform_indices = @transform_1, window_bounds = array<i64: 128, 64>}, {pipeline_mode = #tpu.pipeline_mode<synchronous>, transform_indices = @transform_2, window_bounds = array<i64: 1, 64>}, {pipeline_mode = #tpu.pipeline_mode<synchronous>, transform_indices = @transform_3, window_bounds = array<i64: 64, 32>}, {pipeline_mode = #tpu.pipeline_mode<synchronous>, transform_indices = @transform_4, window_bounds = array<i64: 1, 32>}, {pipeline_mode = #tpu.pipeline_mode<synchronous>, transform_indices = @transform_5, window_bounds = array<i64: 1, 32>}, {pipeline_mode = #tpu.pipeline_mode<synchronous>, transform_indices = @transform_6, window_bounds = array<i64: 1, 32>}, {pipeline_mode = #tpu.pipeline_mode<synchronous>, transform_indices = @transform_7, window_bounds = array<i64: 1, 32>}, {pipeline_mode = #tpu.pipeline_mode<synchronous>, transform_indices = @transform_8, window_bounds = array<i64: 1, 1>}, {transform_indices = @transform_9, window_bounds = array<i64: 8, 1>}]} {
    %c0 = arith.constant 0 : index
    %c0_0 = arith.constant 0 : index
    %0 = vector.load %arg1[%c0, %c0_0] : memref<8x128xf32, #tpu.memory_space<vmem>>, vector<8x128xf32>
    %c0_1 = arith.constant 0 : index
    %c0_2 = arith.constant 0 : index
    %1 = vector.load %arg2[%c0_1, %c0_2] : memref<128x64xf32, #tpu.memory_space<vmem>>, vector<128x64xf32>
    %cst = arith.constant dense<0.000000e+00> : vector<8x64xf32>
    %2 = tpu.matmul %0, %1, %cst {dimension_numbers = #tpu.dot_dimension_numbers<[1], [0], [0], [1], [0, 0, 1, 1], [], []>} : vector<8x128xf32>, vector<128x64xf32>, vector<8x64xf32> -> vector<8x64xf32>
    %c0_3 = arith.constant 0 : index
    %c0_4 = arith.constant 0 : index
    %3 = vector.load %arg3[%c0_3, %c0_4] : memref<1x64xf32, #tpu.memory_space<vmem>>, vector<1x64xf32>
    %4 = vector.broadcast %3 : vector<1x64xf32> to vector<8x64xf32>
    %5 = arith.addf %2, %4 : vector<8x64xf32>
    %cst_5 = arith.constant dense<0.000000e+00> : vector<8xf32>
    %6 = vector.multi_reduction <add>, %5, %cst_5 [1] : vector<8x64xf32> to vector<8xf32>
    %7 = vector.shape_cast %6 : vector<8xf32> to vector<8x1xf32>
    %cst_6 = arith.constant 6.400000e+01 : f32
    %8 = vector.broadcast %cst_6 : f32 to vector<8x1xf32>
    %9 = arith.divf %7, %8 : vector<8x1xf32>
    %10 = arith.mulf %5, %5 : vector<8x64xf32>
    %cst_7 = arith.constant dense<0.000000e+00> : vector<8xf32>
    %11 = vector.multi_reduction <add>, %10, %cst_7 [1] : vector<8x64xf32> to vector<8xf32>
    %12 = vector.shape_cast %11 : vector<8xf32> to vector<8x1xf32>
    %cst_8 = arith.constant 6.400000e+01 : f32
    %13 = vector.broadcast %cst_8 : f32 to vector<8x1xf32>
    %14 = arith.divf %12, %13 : vector<8x1xf32>
    %15 = arith.mulf %9, %9 : vector<8x1xf32>
    %16 = arith.subf %14, %15 : vector<8x1xf32>
    %cst_9 = arith.constant 9.99999974E-6 : f32
    %17 = vector.broadcast %cst_9 : f32 to vector<8x1xf32>
    %18 = arith.addf %16, %17 : vector<8x1xf32>
    %19 = math.rsqrt %18 : vector<8x1xf32>
    %20 = vector.broadcast %9 : vector<8x1xf32> to vector<8x64xf32>
    %21 = arith.subf %5, %20 : vector<8x64xf32>
    %22 = vector.broadcast %19 : vector<8x1xf32> to vector<8x64xf32>
    %23 = arith.mulf %21, %22 : vector<8x64xf32>
    %c0_10 = arith.constant 0 : index
    %c0_11 = arith.constant 0 : index
    %24 = vector.load %arg4[%c0_10, %c0_11] : memref<64x32xf32, #tpu.memory_space<vmem>>, vector<64x32xf32>
    %cst_12 = arith.constant dense<0.000000e+00> : vector<8x32xf32>
    %25 = tpu.matmul %23, %24, %cst_12 {dimension_numbers = #tpu.dot_dimension_numbers<[1], [0], [0], [1], [0, 0, 1, 1], [], []>} : vector<8x64xf32>, vector<64x32xf32>, vector<8x32xf32> -> vector<8x32xf32>
    %c0_13 = arith.constant 0 : index
    %c0_14 = arith.constant 0 : index
    %26 = vector.load %arg5[%c0_13, %c0_14] : memref<1x32xf32, #tpu.memory_space<vmem>>, vector<1x32xf32>
    %27 = vector.broadcast %26 : vector<1x32xf32> to vector<8x32xf32>
    %28 = arith.addf %25, %27 : vector<8x32xf32>
    %cst_15 = arith.constant dense<0.000000e+00> : vector<8xf32>
    %29 = vector.multi_reduction <add>, %28, %cst_15 [1] : vector<8x32xf32> to vector<8xf32>
    %30 = vector.shape_cast %29 : vector<8xf32> to vector<8x1xf32>
    %cst_16 = arith.constant 3.200000e+01 : f32
    %31 = vector.broadcast %cst_16 : f32 to vector<8x1xf32>
    %32 = arith.divf %30, %31 : vector<8x1xf32>
    %33 = arith.mulf %28, %28 : vector<8x32xf32>
    %cst_17 = arith.constant dense<0.000000e+00> : vector<8xf32>
    %34 = vector.multi_reduction <add>, %33, %cst_17 [1] : vector<8x32xf32> to vector<8xf32>
    %35 = vector.shape_cast %34 : vector<8xf32> to vector<8x1xf32>
    %cst_18 = arith.constant 3.200000e+01 : f32
    %36 = vector.broadcast %cst_18 : f32 to vector<8x1xf32>
    %37 = arith.divf %35, %36 : vector<8x1xf32>
    %38 = arith.mulf %32, %32 : vector<8x1xf32>
    %39 = arith.subf %37, %38 : vector<8x1xf32>
    %cst_19 = arith.constant 9.99999974E-6 : f32
    %40 = vector.broadcast %cst_19 : f32 to vector<8x1xf32>
    %41 = arith.addf %39, %40 : vector<8x1xf32>
    %42 = math.rsqrt %41 : vector<8x1xf32>
    %43 = vector.broadcast %32 : vector<8x1xf32> to vector<8x32xf32>
    %44 = arith.subf %28, %43 : vector<8x32xf32>
    %45 = vector.broadcast %42 : vector<8x1xf32> to vector<8x32xf32>
    %46 = arith.mulf %44, %45 : vector<8x32xf32>
    %c0_20 = arith.constant 0 : index
    %c0_21 = arith.constant 0 : index
    %47 = vector.load %arg6[%c0_20, %c0_21] : memref<1x32xf32, #tpu.memory_space<vmem>>, vector<1x32xf32>
    %48 = vector.broadcast %47 : vector<1x32xf32> to vector<8x32xf32>
    %49 = arith.mulf %46, %48 : vector<8x32xf32>
    %c0_22 = arith.constant 0 : index
    %c0_23 = arith.constant 0 : index
    %50 = vector.load %arg7[%c0_22, %c0_23] : memref<1x32xf32, #tpu.memory_space<vmem>>, vector<1x32xf32>
    %51 = vector.broadcast %50 : vector<1x32xf32> to vector<8x32xf32>
    %52 = arith.addf %49, %51 : vector<8x32xf32>
    %cst_24 = arith.constant 0.00999999977 : f32
    %53 = vector.broadcast %cst_24 : f32 to vector<8x32xf32>
    %54 = arith.mulf %52, %53 : vector<8x32xf32>
    %55 = arith.maximumf %52, %54 : vector<8x32xf32>
    %c0_25 = arith.constant 0 : index
    %c0_26 = arith.constant 0 : index
    %56 = vector.load %arg8[%c0_25, %c0_26] : memref<1x32xf32, #tpu.memory_space<vmem>>, vector<1x32xf32>
    %57 = vector.broadcast %56 : vector<1x32xf32> to vector<8x32xf32>
    %58 = arith.mulf %55, %57 : vector<8x32xf32>
    %cst_27 = arith.constant dense<0.000000e+00> : vector<8xf32>
    %59 = vector.multi_reduction <add>, %58, %cst_27 [1] : vector<8x32xf32> to vector<8xf32>
    %60 = vector.shape_cast %59 : vector<8xf32> to vector<8x1xf32>
    %c0_28 = arith.constant 0 : index
    %c0_29 = arith.constant 0 : index
    %61 = vector.load %arg9[%c0_28, %c0_29] : memref<1x1xf32, #tpu.memory_space<vmem>>, vector<1x1xf32>
    %62 = vector.broadcast %61 : vector<1x1xf32> to vector<8x1xf32>
    %63 = arith.addf %60, %62 : vector<8x1xf32>
    %c0_30 = arith.constant 0 : index
    %c0_31 = arith.constant 0 : index
    %64 = vector.load %arg10[%c0_30, %c0_31] : memref<8x1xf32, #tpu.memory_space<vmem>>, vector<8x1xf32>
    tpu.vector_store %arg10[%c0_30, %c0_31], %63 {strides = array<i32>} : memref<8x1xf32, #tpu.memory_space<vmem>>, vector<8x1xf32>,
    return
  }
  func.func @transform_0(%arg0: i32) -> (i32, i32) {
    %c0_i32 = arith.constant 0 : i32
    %c0_i32_0 = arith.constant 0 : i32
    return %arg0, %c0_i32 : i32, i32
  }
  func.func @transform_1(%arg0: i32) -> (i32, i32) {
    %c0_i32 = arith.constant 0 : i32
    %c0_i32_0 = arith.constant 0 : i32
    %c0_i32_1 = arith.constant 0 : i32
    return %c0_i32, %c0_i32_0 : i32, i32
  }
  func.func @transform_2(%arg0: i32) -> (i32, i32) {
    %c0_i32 = arith.constant 0 : i32
    %c0_i32_0 = arith.constant 0 : i32
    %c0_i32_1 = arith.constant 0 : i32
    return %c0_i32, %c0_i32_0 : i32, i32
  }
  func.func @transform_3(%arg0: i32) -> (i32, i32) {
    %c0_i32 = arith.constant 0 : i32
    %c0_i32_0 = arith.constant 0 : i32
    %c0_i32_1 = arith.constant 0 : i32
    return %c0_i32, %c0_i32_0 : i32, i32
  }
  func.func @transform_4(%arg0: i32) -> (i32, i32) {
    %c0_i32 = arith.constant 0 : i32
    %c0_i32_0 = arith.constant 0 : i32
    %c0_i32_1 = arith.constant 0 : i32
    return %c0_i32, %c0_i32_0 : i32, i32
  }
  func.func @transform_5(%arg0: i32) -> (i32, i32) {
    %c0_i32 = arith.constant 0 : i32
    %c0_i32_0 = arith.constant 0 : i32
    %c0_i32_1 = arith.constant 0 : i32
    return %c0_i32, %c0_i32_0 : i32, i32
  }
  func.func @transform_6(%arg0: i32) -> (i32, i32) {
    %c0_i32 = arith.constant 0 : i32
    %c0_i32_0 = arith.constant 0 : i32
    %c0_i32_1 = arith.constant 0 : i32
    return %c0_i32, %c0_i32_0 : i32, i32
  }
  func.func @transform_7(%arg0: i32) -> (i32, i32) {
    %c0_i32 = arith.constant 0 : i32
    %c0_i32_0 = arith.constant 0 : i32
    %c0_i32_1 = arith.constant 0 : i32
    return %c0_i32, %c0_i32_0 : i32, i32
  }
  func.func @transform_8(%arg0: i32) -> (i32, i32) {
    %c0_i32 = arith.constant 0 : i32
    %c0_i32_0 = arith.constant 0 : i32
    %c0_i32_1 = arith.constant 0 : i32
    return %c0_i32, %c0_i32_0 : i32, i32
  }
  func.func @transform_9(%arg0: i32) -> (i32, i32) {
    %c0_i32 = arith.constant 0 : i32
    %c0_i32_0 = arith.constant 0 : i32
    return %arg0, %c0_i32 : i32, i32
  }
}

</mosaic_0001>

<bundles_post_ra>
// kernel: discriminator_forward.1
= control target key start
LH: loop header
LB: loop body
LE: loop exit
PB: predicated region body
PF: predicated region fallthrough
CT: control target
= control target key end

     0   :  { %v386_v0 = vmov 0.0   ;;  %vm387_vm0 = vmmov 0   ;;  %vm128_vm1 = vcmask 523264   ;;  %vm233_vm2 = vcmask 261120   ;;  %s566_s1 = inlined_call_operand.vmem [shape: f32[128,64], index: 1, kind: input, shape index: {}]   ;;  %s567_s0 = inlined_call_operand.vmem [shape: f32[8,128], index: 0, kind: input, shape index: {}]   ;;  %s568_s2 = inlined_call_operand.vmem [shape: f32[1,64], index: 2, kind: input, shape index: {}]   ;;  %s569_s3 = inlined_call_operand.vmem [shape: f32[64,32], index: 3, kind: input, shape index: {}]   ;;  %s570_s4 = inlined_call_operand.vmem [shape: f32[1,32], index: 4, kind: input, shape index: {}]   ;;  %s571_s8 = inlined_call_operand.<no memory space> [shape: f32[1,1], index: 8, kind: input, shape index: {}]   ;;  %s572_s5 = inlined_call_operand.vmem [shape: f32[1,32], index: 5, kind: input, shape index: {}]   ;;  %s573_s6 = inlined_call_operand.vmem [shape: f32[1,32], index: 6, kind: input, shape index: {}]   ;;  %s574_s7 = inlined_call_operand.vmem [shape: f32[1,32], index: 7, kind: input, shape index: {}]   ;;  %s575_s9 = inlined_call_operand.vmem [shape: f32[8,1], index: 9, kind: output, shape index: {}]  }
   0x1   :  { %326 = vmatprep.subr.mxu0 %v386_v0  ;;  %v50_v1 = vld [vmem:[%s566_s1 + $0x78] sm:$0xff]  ;;  %v49_v2 = vld [vmem:[%s566_s1 + $0x70] sm:$0xff]  ;;  %358 = vmatprep.mubr.msk.f32.mxu0 %vm387_vm0, %v386_v0  ;;  %v48_v3 = vld [vmem:[%s566_s1 + $0x68] sm:$0xff]  ;;  %v14_v50 = vstv %s571_s8  ;;  %vm287_vm3 = vcmask 7168  }
   0x2   :  { %327 = vmatpush3.msra.mxu0 %v50_v1  ;;  %361 = vmatprep.subr.mxu1 %v386_v0  ;;  %v47_v4 = vld [vmem:[%s566_s1 + $0x60] sm:$0xff]  ;;  %v46_v5 = vld [vmem:[%s566_s1 + $0x58] sm:$0xff]  ;;  %v45_v6 = vld [vmem:[%s566_s1 + $0x50] sm:$0xff]  ;;  %15 = vst [vmem:[#allocation2] sm:$0x1] %v14_v50 }
   0x3   :  { %328 = vmatprep.subr.mxu0 %v386_v0  ;;  %377 = vmatprep.mubr.msk.f32.mxu1 %vm387_vm0, %v386_v0  ;;  %v44_v7 = vld [vmem:[%s566_s1 + $0x48] sm:$0xff]  ;;  %v43_v8 = vld [vmem:[%s566_s1 + $0x40] sm:$0xff]  ;;  %v42_v9 = vld [vmem:[%s566_s1 + $0x38] sm:$0xff] }
   0x4   :  { %329 = vmatpush3.msra.mxu0 %v49_v2  ;;  %v41_v10 = vld [vmem:[%s566_s1 + $0x30] sm:$0xff]  ;;  %v40_v11 = vld [vmem:[%s566_s1 + $0x28] sm:$0xff]  ;;  %v39_v12 = vld [vmem:[%s566_s1 + $0x20] sm:$0xff] }
   0x5   :  { %330 = vmatprep.subr.mxu0 %v386_v0  ;;  %v38_v13 = vld [vmem:[%s566_s1 + $0x18] sm:$0xff]  ;;  %v37_v14 = vld [vmem:[%s566_s1 + $0x10] sm:$0xff]  ;;  %v36_v15 = vld [vmem:[%s566_s1 + $0x8] sm:$0xff] }
   0x6   :  { %331 = vmatpush3.msra.mxu0 %v48_v3  ;;  %v35_v16 = vld [vmem:[%s566_s1] sm:$0xff]  ;;  %v152_v25 = vld [vmem:[%s569_s3 + $0x38] sm:$0xff]  ;;  %v151_v26 = vld [vmem:[%s569_s3 + $0x30] sm:$0xff] }
   0x7   :  { %332 = vmatprep.subr.mxu0 %v386_v0  ;;  %v34_v17 = vld [vmem:[%s567_s0] sm:$0xff]  ;;  %362 = vmatpush3.msra.mxu1 %v152_v25  ;;  %v150_v27 = vld [vmem:[%s569_s3 + $0x28] sm:$0xff]  ;;  %v148_v29 = vld [vmem:[%s569_s3 + $0x18] sm:$0xff] }
   0x8   :  { %333 = vmatpush3.msra.mxu0 %v47_v4  ;;  %v293_v18 = vld [vmem:[%s568_s2] ss:$0 sm:$0xff]  ;;  %363 = vmatprep.subr.mxu1 %v386_v0  ;;  %v147_v30 = vld [vmem:[%s569_s3 + $0x10] sm:$0xff]  ;;  %v146_v31 = vld [vmem:[%s569_s3 + $0x8] sm:$0xff] }
   0x9   :  { %334 = vmatprep.subr.mxu0 %v386_v0  ;;  %364 = vmatpush3.msra.mxu1 %v151_v26  ;;  %v149_v28 = vld [vmem:[%s569_s3 + $0x20] sm:$0xff] }
   0xa   :  { %335 = vmatpush3.msra.mxu0 %v46_v5  ;;  %365 = vmatprep.subr.mxu1 %v386_v0  ;;  %v145_v32 = vld [vmem:[%s569_s3] sm:$0xff] }
   0xb   :  { %336 = vmatprep.subr.mxu0 %v386_v0  ;;  %366 = vmatpush3.msra.mxu1 %v150_v27  ;;  %v294_v43 = vld [vmem:[%s570_s4] ss:$0 sm:$0xff] }
   0xc   :  { %337 = vmatpush3.msra.mxu0 %v45_v6  ;;  %367 = vmatprep.subr.mxu1 %v386_v0  ;;  %v296_v60 = vld [vmem:[%s572_s5] ss:$0 sm:$0xff] }
   0xd   :  { %338 = vmatprep.subr.mxu0 %v386_v0  ;;  %368 = vmatpush3.msra.mxu1 %v149_v28  ;;  %v297_v62 = vld [vmem:[%s573_s6] ss:$0 sm:$0xff] }
   0xe   :  { %339 = vmatpush3.msra.mxu0 %v44_v7  ;;  %369 = vmatprep.subr.mxu1 %v386_v0  ;;  %v298_v2 = vld [vmem:[%s574_s7] ss:$0 sm:$0xff] }
   0xf   :  { %340 = vmatprep.subr.mxu0 %v386_v0  ;;  %370 = vmatpush3.msra.mxu1 %v148_v29  ;;  %v299_v6 = vld [vmem:[#allocation2] ss:$0 sm:$0xff] }
  0x10   :  { %341 = vmatpush3.msra.mxu0 %v43_v8  ;;  %371 = vmatprep.subr.mxu1 %v386_v0 }
  0x11   :  { %342 = vmatprep.subr.mxu0 %v386_v0  ;;  %372 = vmatpush3.msra.mxu1 %v147_v30 }
  0x12   :  { %343 = vmatpush3.msra.mxu0 %v42_v9  ;;  %373 = vmatprep.subr.mxu1 %v386_v0 }
  0x13   :  { %344 = vmatprep.subr.mxu0 %v386_v0  ;;  %374 = vmatpush3.msra.mxu1 %v146_v31 }
  0x14   :  { %345 = vmatpush3.msra.mxu0 %v41_v10  ;;  %375 = vmatprep.subr.mxu1 %v386_v0 }
  0x15   :  { %346 = vmatprep.subr.mxu0 %v386_v0  ;;  %376 = vmatpush3.msra.mxu1 %v145_v32 }
  0x16   :  { %347 = vmatpush3.msra.mxu0 %v40_v11 }
  0x17   :  { %348 = vmatprep.subr.mxu0 %v386_v0 }
  0x18   :  { %349 = vmatpush3.msra.mxu0 %v39_v12 }
  0x19   :  { %350 = vmatprep.subr.mxu0 %v386_v0 }
  0x1a   :  { %351 = vmatpush3.msra.mxu0 %v38_v13 }
  0x1b   :  { %352 = vmatprep.subr.mxu0 %v386_v0 }
  0x1c   :  { %353 = vmatpush3.msra.mxu0 %v37_v14 }
  0x1d   :  { %354 = vmatprep.subr.mxu0 %v386_v0 }
  0x1e   :  { %355 = vmatpush3.msra.mxu0 %v36_v15 }
  0x1f   :  { %356 = vmatprep.subr.mxu0 %v386_v0 }
  0x20   :  { %357 = vmatpush3.msra.mxu0 %v35_v16 }
  0x21   :  { %359 = vmatmul.mubr.f32.vlgmr.msra.gmra.mxu0 %v34_v17 }
  0xe1   :  { %v124_v19 = vpop.f32.mrf.mxu0 }
  0xe2   :  { %v125_v20 = vadd.f32 %v293_v18, %v124_v19 }
  0xe3   :  { %v360_v21 = vpop.f32.mrf.mxu0 }
  0xe4   :  { %v129_v22 = vsel %vm128_vm1, %v125_v20, 0.0  ;;  %v134_v23 = vmul.f32 %v125_v20, %v125_v20 }
  0xe5   :  { %130 = vadd.xlane.f32.xlu0 %v129_v22 }
  0xe6   :  { %v135_v24 = vsel %vm128_vm1, %v134_v23, 0.0 }
  0xe9   :  { %136 = vadd.xlane.f32.xlu0 %v135_v24 }
 0x16e   :  { %v131_v33 = vpop.xlane.xlu0 %130 }
 0x16f   :  { %v133_v34 = vmul.f32 0.015625, %v131_v33 }
 0x171   :  { %v139_v36 = vmul.f32 %v133_v34, %v133_v34  ;;  %v143_v40 = vsub.f32 %v125_v20, %v133_v34 }
 0x172   :  { %v137_v35 = vpop.xlane.xlu0 %136 }
 0x173   :  { %v138_v37 = vmul.f32 0.015625, %v137_v35 }
 0x175   :  { %v140_v38 = vsub.f32 %v138_v37, %v139_v36 }
 0x177   :  { %v141_v39 = vadd.f32 1e-05, %v140_v38 }
 0x179   :  { %382 = vrsqrt.f32 %v141_v39 }
 0x186   :  { %v383_v41 = vpop.eup %382 }
 0x187   :  { %v144_v42 = vmul.f32 %v383_v41, %v143_v40 }
 0x189   :  { %378 = vmatmul.mubr.msk.f32.vlgmr.msra.gmra.mxu1 %vm128_vm1, %v144_v42 }
 0x249   :  { %v229_v44 = vpop.f32.mrf.mxu1 }
 0x24a   :  { %v230_v45 = vadd.f32 %v294_v43, %v229_v44 }
 0x24b   :  { %v379_v46 = vpop.f32.mrf.mxu1 }
 0x24c   :  { %v234_v47 = vsel %vm233_vm2, %v230_v45, 0.0  ;;  %v239_v48 = vmul.f32 %v230_v45, %v230_v45 }
 0x24d   :  { %235 = vadd.xlane.f32.xlu1 %v234_v47 }
 0x24e   :  { %v240_v49 = vsel %vm233_vm2, %v239_v48, 0.0 }
 0x251   :  { %241 = vadd.xlane.f32.xlu1 %v240_v49 }
 0x2d6   :  { %v236_v51 = vpop.xlane.xlu1 %235 }
 0x2d7   :  { %v238_v52 = vmul.f32 0.03125, %v236_v51 }
 0x2d9   :  { %v244_v54 = vmul.f32 %v238_v52, %v238_v52  ;;  %v248_v58 = vsub.f32 %v230_v45, %v238_v52 }
 0x2da   :  { %v242_v53 = vpop.xlane.xlu1 %241 }
 0x2db   :  { %v243_v55 = vmul.f32 0.03125, %v242_v53 }
 0x2dd   :  { %v245_v56 = vsub.f32 %v243_v55, %v244_v54 }
 0x2df   :  { %v246_v57 = vadd.f32 1e-05, %v245_v56 }
 0x2e1   :  { %384 = vrsqrt.f32 %v246_v57 }
 0x2ee   :  { %v385_v59 = vpop.eup %384 }
 0x2ef   :  { %v249_v61 = vmul.f32 %v385_v59, %v248_v58 }
 0x2f1   :  { %v257_v63 = vmul.f32 %v296_v60, %v249_v61 }
 0x2f3   :  { %v265_v0 = vadd.f32 %v297_v62, %v257_v63 }
 0x2f5   :  { %v266_v1 = vmul.f32 0.01, %v265_v0 }
 0x2f7   :  { %v267_v3 = vmax.f32 %v265_v0, %v266_v1 }
 0x2f9   :  { %v275_v4 = vmul.f32 %v298_v2, %v267_v3 }
 0x2fb   :  { %v276_v5 = vsel %vm233_vm2, %v275_v4, 0.0 }
 0x2fc   :  { %277 = vadd.xlane.f32.xlu0 %v276_v5 }
 0x385   :  { %v278_v7 = vpop.xlane.xlu0 %277 }
 0x386   :  { %v286_v8 = vadd.f32 %v299_v6, %v278_v7 }
 0x388   :  { %288 = vst.msk [vmem:[%s575_s9] sm:$0xff] %vm287_vm3, %v286_v8 }

</bundles_post_ra>
